<compile_context>
chip_gen: v5e
topology: v5e:2x2
jax: 0.10.0
libtpu: 0.0.40
codegen_flags: <defaults>
</compile_context>

<pallas_src>
import numpy as np
import jax
import jax.numpy as jnp
from jax.experimental import pallas as pl
from jax.experimental.pallas import tpu as pltpu

# config.network.bbox_reg_weights / config.test.score_thresh (synthetic, deterministic)
BBOX_REG_WEIGHTS = (10.0, 10.0, 5.0, 5.0)
SCORE_THRESH = 0.05


def _round_up(x, m):
    return ((x + m - 1) // m) * m


def _mask_roi_kernel(im_ref, rois_ref, delta_ref, prob_ref, prop_ref, mask_ref):
    # rois_ref: (4, TN)  rows = xmin, ymin, xmax, ymax
    xmin = rois_ref[0:1, :]
    ymin = rois_ref[1:2, :]
    xmax = rois_ref[2:3, :]
    ymax = rois_ref[3:4, :]

    bbox_w = xmax - xmin + 1.0
    bbox_h = ymax - ymin + 1.0
    ctr_x = xmin + 0.5 * bbox_w
    ctr_y = ymin + 0.5 * bbox_h

    # delta_ref: (4, C, TN) -> dx, dy, dw, dh each (C, TN)
    dx = delta_ref[0] * (1.0 / BBOX_REG_WEIGHTS[0])
    dy = delta_ref[1] * (1.0 / BBOX_REG_WEIGHTS[1])
    dw = delta_ref[2] * (1.0 / BBOX_REG_WEIGHTS[2])
    dh = delta_ref[3] * (1.0 / BBOX_REG_WEIGHTS[3])

    # (1, TN) per-ROI stats broadcast over the C sublanes (cheap sublane bcast)
    pred_cx = ctr_x + bbox_w * dx
    pred_cy = ctr_y + bbox_h * dy
    half_w = 0.5 * (bbox_w * jnp.exp(dw))
    half_h = 0.5 * (bbox_h * jnp.exp(dh))

    # clip_boxes(proposal, im_info[0, :2]): x in [0, W-1], y in [0, H-1]
    im_h = im_ref[0]
    im_w = im_ref[1]

    x1 = jnp.minimum(jnp.maximum(pred_cx - half_w, 0.0), im_w - 1.0)
    y1 = jnp.minimum(jnp.maximum(pred_cy - half_h, 0.0), im_h - 1.0)
    x2 = jnp.minimum(jnp.maximum(pred_cx + half_w - 1.0, 0.0), im_w - 1.0)
    y2 = jnp.minimum(jnp.maximum(pred_cy + half_h - 1.0, 0.0), im_h - 1.0)

    # single fused proposal output, lane-dense (C, TN) slab stores
    prop_ref[0] = x1
    prop_ref[1] = y1
    prop_ref[2] = x2
    prop_ref[3] = y2

    # score thresholding mask (cls_prob[:, j] > score_thresh) for all classes
    mask_ref[...] = (prob_ref[...] > SCORE_THRESH).astype(jnp.float32)


def mask_roi_decode(bottom_rois, bbox_delta, cls_prob, im_info, *, tile_n=None):
    """Pallas implementation of the bbox_pred + clip_boxes + score-threshold
    portion of MaskROI.forward.

    Returns:
      proposal: [N, 4 * num_reg_classes]  decoded & clipped boxes
                (x1, y1, x2, y2 interleaved per class, as in the PyTorch code)
      mask:     [N, num_classes] float32 1.0 where cls_prob > score_thresh
    """
    n = bottom_rois.shape[0]
    num_reg_classes = bbox_delta.shape[1] // 4
    num_classes = cls_prob.shape[1]

    # --- layout plumbing: ROI axis -> lane axis ------------------------------
    delta_t = bbox_delta.astype(jnp.float32).reshape(n, num_reg_classes, 4)
    delta_t = jnp.transpose(delta_t, (2, 1, 0))            # (4, C, N)
    prob_t = cls_prob.astype(jnp.float32).T                # (Cc, N)
    rois_t = bottom_rois[:, 1:5].astype(jnp.float32).T     # (4, N)
    im_hw = im_info[0, :2].astype(jnp.float32)              # [height, width]

    # --- tile selection (VMEM-budgeted, lane multiple of 128) ---------------
    if tile_n is None:
        # f32 rows resident per lane: delta in+out (2*4C) + prob/mask (2*Cc) + rois (4)
        rows = 2 * 4 * num_reg_classes + 2 * num_classes + 4
        budget = 16 << 20  # bytes for both pipeline buffers; safe on v5e/v6e/v7x
        vmem_tile = max(128, (budget // (rows * 4 * 2)) // 128 * 128)
        tile_n = min(4096, vmem_tile, _round_up(n, 128))
    n_pad = _round_up(n, tile_n)
    pad = n_pad - n
    if pad:
        # zero padding is numerically safe (exp(0)=1, no inf/nan); sliced off below
        delta_t = jnp.pad(delta_t, ((0, 0), (0, 0), (0, pad)))
        prob_t = jnp.pad(prob_t, ((0, 0), (0, pad)))
        rois_t = jnp.pad(rois_t, ((0, 0), (0, pad)))

    grid = (n_pad // tile_n,)

    out_shape = (
        jax.ShapeDtypeStruct((4, num_reg_classes, n_pad), jnp.float32),
        jax.ShapeDtypeStruct((num_classes, n_pad), jnp.float32),
    )

    prop_t, mask_t = pl.pallas_call(
        _mask_roi_kernel,
        out_shape=out_shape,
        grid=grid,
        in_specs=[
            pl.BlockSpec(memory_space=pltpu.MemorySpace.SMEM),            # im_hw scalars
            pl.BlockSpec((4, tile_n), lambda i: (0, i)),                  # rois_t
            pl.BlockSpec((4, num_reg_classes, tile_n), lambda i: (0, 0, i)),  # delta_t
            pl.BlockSpec((num_classes, tile_n), lambda i: (0, i)),        # prob_t
        ],
        out_specs=[
            pl.BlockSpec((4, num_reg_classes, tile_n), lambda i: (0, 0, i)),  # proposal
            pl.BlockSpec((num_classes, tile_n), lambda i: (0, i)),            # mask
        ],
        compiler_params=pltpu.CompilerParams(
            dimension_semantics=("parallel",)),
    )(im_hw, rois_t, delta_t, prob_t)

    # back to the module's interleaved [N, 4*C] layout
    proposal = jnp.transpose(prop_t, (2, 1, 0)).reshape(n_pad, 4 * num_reg_classes)[:n]
    mask = mask_t.T[:n]
    return proposal, mask


def _reference(bottom_rois, bbox_delta, cls_prob, im_info):
    rois = np.asarray(bottom_rois, np.float32)
    delta = np.asarray(bbox_delta, np.float32)
    n = rois.shape[0]
    c = delta.shape[1] // 4
    xmin, ymin, xmax, ymax = rois[:, 1], rois[:, 2], rois[:, 3], rois[:, 4]
    bw = xmax - xmin + 1.0
    bh = ymax - ymin + 1.0
    cx = xmin + 0.5 * bw
    cy = ymin + 0.5 * bh
    d = delta.reshape(n, c, 4)
    dx = d[..., 0] / BBOX_REG_WEIGHTS[0]
    dy = d[..., 1] / BBOX_REG_WEIGHTS[1]
    dw = d[..., 2] / BBOX_REG_WEIGHTS[2]
    dh = d[..., 3] / BBOX_REG_WEIGHTS[3]
    pcx = cx[:, None] + bw[:, None] * dx
    pcy = cy[:, None] + bh[:, None] * dy
    pw = bw[:, None] * np.exp(dw)
    ph = bh[:, None] * np.exp(dh)
    x1 = pcx - 0.5 * pw
    y1 = pcy - 0.5 * ph
    x2 = pcx + 0.5 * pw - 1.0
    y2 = pcy + 0.5 * ph - 1.0
    im_h, im_w = float(im_info[0, 0]), float(im_info[0, 1])
    x1 = np.clip(x1, 0.0, im_w - 1.0)
    x2 = np.clip(x2, 0.0, im_w - 1.0)
    y1 = np.clip(y1, 0.0, im_h - 1.0)
    y2 = np.clip(y2, 0.0, im_h - 1.0)
    proposal = np.stack([x1, y1, x2, y2], axis=-1).reshape(n, c * 4)
    mask = (np.asarray(cls_prob) > SCORE_THRESH).astype(np.float32)
    return proposal, mask


if __name__ == "__main__":
    key = jax.random.PRNGKey(0)
    N = 22                 # number of ROIs (deliberately not a multiple of 8/128)
    NUM_CLASSES = 4        # num_classes (bbox_class_agnostic=False -> 4*num_classes deltas)
    IM_H, IM_W = 64.0, 64.0

    k1, k2, k3, k4 = jax.random.split(key, 4)
    x1y1 = jax.random.uniform(k1, (N, 2), minval=0.0, maxval=40.0)
    wh = jax.random.uniform(k2, (N, 2), minval=4.0, maxval=20.0)
    bottom_rois = jnp.concatenate(
        [jnp.zeros((N, 1), jnp.float32), x1y1, x1y1 + wh], axis=1).astype(jnp.float32)

    bbox_delta = (0.5 * jax.random.normal(k3, (N, 4 * NUM_CLASSES))).astype(jnp.float32)
    logits = jax.random.normal(k4, (N, NUM_CLASSES))
    cls_prob = jax.nn.softmax(logits, axis=-1).astype(jnp.float32)
    im_info = jnp.array([[IM_H, IM_W, 1.0]], jnp.float32)

    decode = jax.jit(mask_roi_decode)
    proposal, mask = decode(bottom_rois, bbox_delta, cls_prob, im_info)
    proposal = jax.block_until_ready(proposal)
    mask = jax.block_until_ready(mask)

    ref_prop, ref_mask = _reference(bottom_rois, bbox_delta, cls_prob, im_info)
    assert np.allclose(np.asarray(proposal), ref_prop, rtol=1e-4, atol=1e-4)
    assert np.array_equal(np.asarray(mask), ref_mask)

    print("KERNEL_OK")
</pallas_src>

<mosaic_0001>
module attributes {stable_mosaic.version = 11 : i64} {
  func.func @_mask_roi_kernel(%arg0: i32, %arg1: memref<2xf32, #tpu.memory_space<smem>>, %arg2: memref<4x128xf32, #tpu.memory_space<vmem>>, %arg3: memref<4x4x128xf32, #tpu.memory_space<vmem>>, %arg4: memref<4x128xf32, #tpu.memory_space<vmem>>, %arg5: memref<4x4x128xf32, #tpu.memory_space<vmem>>, %arg6: memref<4x128xf32, #tpu.memory_space<vmem>>) attributes {dimension_semantics = [#tpu.dimension_semantics<parallel>], iteration_bounds = array<i64: 1>, scalar_prefetch = 0 : i64, scratch_operands = 0 : i64, tpu.core_type = #tpu.core_type<tc>, window_params = [{transform_indices = @transform_0, window_bounds = array<i64: 2>}, {transform_indices = @transform_1, window_bounds = array<i64: 4, 128>}, {transform_indices = @transform_2, window_bounds = array<i64: 4, 4, 128>}, {transform_indices = @transform_3, window_bounds = array<i64: 4, 128>}, {transform_indices = @transform_4, window_bounds = array<i64: 4, 4, 128>}, {transform_indices = @transform_5, window_bounds = array<i64: 4, 128>}]} {
    %c0 = arith.constant 0 : index
    %c0_0 = arith.constant 0 : index
    %0 = vector.load %arg2[%c0, %c0_0] : memref<4x128xf32, #tpu.memory_space<vmem>>, vector<1x128xf32>
    %c1 = arith.constant 1 : index
    %c0_1 = arith.constant 0 : index
    %1 = vector.load %arg2[%c1, %c0_1] : memref<4x128xf32, #tpu.memory_space<vmem>>, vector<1x128xf32>
    %c2 = arith.constant 2 : index
    %c0_2 = arith.constant 0 : index
    %2 = vector.load %arg2[%c2, %c0_2] : memref<4x128xf32, #tpu.memory_space<vmem>>, vector<1x128xf32>
    %c3 = arith.constant 3 : index
    %c0_3 = arith.constant 0 : index
    %3 = vector.load %arg2[%c3, %c0_3] : memref<4x128xf32, #tpu.memory_space<vmem>>, vector<1x128xf32>
    %4 = arith.subf %2, %0 : vector<1x128xf32>
    %cst = arith.constant 1.000000e+00 : f32
    %5 = vector.broadcast %cst : f32 to vector<1x128xf32>
    %6 = arith.addf %4, %5 : vector<1x128xf32>
    %7 = arith.subf %3, %1 : vector<1x128xf32>
    %cst_4 = arith.constant 1.000000e+00 : f32
    %8 = vector.broadcast %cst_4 : f32 to vector<1x128xf32>
    %9 = arith.addf %7, %8 : vector<1x128xf32>
    %cst_5 = arith.constant 5.000000e-01 : f32
    %10 = vector.broadcast %cst_5 : f32 to vector<1x128xf32>
    %11 = arith.mulf %10, %6 : vector<1x128xf32>
    %12 = arith.addf %0, %11 : vector<1x128xf32>
    %cst_6 = arith.constant 5.000000e-01 : f32
    %13 = vector.broadcast %cst_6 : f32 to vector<1x128xf32>
    %14 = arith.mulf %13, %9 : vector<1x128xf32>
    %15 = arith.addf %1, %14 : vector<1x128xf32>
    %c0_7 = arith.constant 0 : index
    %c0_8 = arith.constant 0 : index
    %c0_9 = arith.constant 0 : index
    %16 = vector.load %arg3[%c0_7, %c0_8, %c0_9] : memref<4x4x128xf32, #tpu.memory_space<vmem>>, vector<1x4x128xf32>
    %17 = vector.shape_cast %16 : vector<1x4x128xf32> to vector<4x128xf32>
    %cst_10 = arith.constant 1.000000e-01 : f32
    %18 = vector.broadcast %cst_10 : f32 to vector<4x128xf32>
    %19 = arith.mulf %17, %18 : vector<4x128xf32>
    %c1_11 = arith.constant 1 : index
    %c0_12 = arith.constant 0 : index
    %c0_13 = arith.constant 0 : index
    %20 = vector.load %arg3[%c1_11, %c0_12, %c0_13] : memref<4x4x128xf32, #tpu.memory_space<vmem>>, vector<1x4x128xf32>
    %21 = vector.shape_cast %20 : vector<1x4x128xf32> to vector<4x128xf32>
    %cst_14 = arith.constant 1.000000e-01 : f32
    %22 = vector.broadcast %cst_14 : f32 to vector<4x128xf32>
    %23 = arith.mulf %21, %22 : vector<4x128xf32>
    %c2_15 = arith.constant 2 : index
    %c0_16 = arith.constant 0 : index
    %c0_17 = arith.constant 0 : index
    %24 = vector.load %arg3[%c2_15, %c0_16, %c0_17] : memref<4x4x128xf32, #tpu.memory_space<vmem>>, vector<1x4x128xf32>
    %25 = vector.shape_cast %24 : vector<1x4x128xf32> to vector<4x128xf32>
    %cst_18 = arith.constant 2.000000e-01 : f32
    %26 = vector.broadcast %cst_18 : f32 to vector<4x128xf32>
    %27 = arith.mulf %25, %26 : vector<4x128xf32>
    %c3_19 = arith.constant 3 : index
    %c0_20 = arith.constant 0 : index
    %c0_21 = arith.constant 0 : index
    %28 = vector.load %arg3[%c3_19, %c0_20, %c0_21] : memref<4x4x128xf32, #tpu.memory_space<vmem>>, vector<1x4x128xf32>
    %29 = vector.shape_cast %28 : vector<1x4x128xf32> to vector<4x128xf32>
    %cst_22 = arith.constant 2.000000e-01 : f32
    %30 = vector.broadcast %cst_22 : f32 to vector<4x128xf32>
    %31 = arith.mulf %29, %30 : vector<4x128xf32>
    %32 = vector.broadcast %6 : vector<1x128xf32> to vector<4x128xf32>
    %33 = arith.mulf %32, %19 : vector<4x128xf32>
    %34 = vector.broadcast %12 : vector<1x128xf32> to vector<4x128xf32>
    %35 = arith.addf %34, %33 : vector<4x128xf32>
    %36 = vector.broadcast %9 : vector<1x128xf32> to vector<4x128xf32>
    %37 = arith.mulf %36, %23 : vector<4x128xf32>
    %38 = vector.broadcast %15 : vector<1x128xf32> to vector<4x128xf32>
    %39 = arith.addf %38, %37 : vector<4x128xf32>
    %40 = math.exp %27 : vector<4x128xf32>
    %41 = vector.broadcast %6 : vector<1x128xf32> to vector<4x128xf32>
    %42 = arith.mulf %41, %40 : vector<4x128xf32>
    %cst_23 = arith.constant 5.000000e-01 : f32
    %43 = vector.broadcast %cst_23 : f32 to vector<4x128xf32>
    %44 = arith.mulf %43, %42 : vector<4x128xf32>
    %45 = math.exp %31 : vector<4x128xf32>
    %46 = vector.broadcast %9 : vector<1x128xf32> to vector<4x128xf32>
    %47 = arith.mulf %46, %45 : vector<4x128xf32>
    %cst_24 = arith.constant 5.000000e-01 : f32
    %48 = vector.broadcast %cst_24 : f32 to vector<4x128xf32>
    %49 = arith.mulf %48, %47 : vector<4x128xf32>
    %c0_25 = arith.constant 0 : index
    %50 = memref.load %arg1[%c0_25] : memref<2xf32, #tpu.memory_space<smem>>
    %c1_26 = arith.constant 1 : index
    %51 = memref.load %arg1[%c1_26] : memref<2xf32, #tpu.memory_space<smem>>
    %52 = arith.subf %35, %44 : vector<4x128xf32>
    %cst_27 = arith.constant 0.000000e+00 : f32
    %53 = vector.broadcast %cst_27 : f32 to vector<4x128xf32>
    %54 = arith.maximumf %52, %53 : vector<4x128xf32>
    %cst_28 = arith.constant 1.000000e+00 : f32
    %55 = arith.subf %51, %cst_28 : f32
    %56 = vector.broadcast %55 : f32 to vector<4x128xf32>
    %57 = arith.minimumf %54, %56 : vector<4x128xf32>
    %58 = arith.subf %39, %49 : vector<4x128xf32>
    %cst_29 = arith.constant 0.000000e+00 : f32
    %59 = vector.broadcast %cst_29 : f32 to vector<4x128xf32>
    %60 = arith.maximumf %58, %59 : vector<4x128xf32>
    %cst_30 = arith.constant 1.000000e+00 : f32
    %61 = arith.subf %50, %cst_30 : f32
    %62 = vector.broadcast %61 : f32 to vector<4x128xf32>
    %63 = arith.minimumf %60, %62 : vector<4x128xf32>
    %64 = arith.addf %35, %44 : vector<4x128xf32>
    %cst_31 = arith.constant 1.000000e+00 : f32
    %65 = vector.broadcast %cst_31 : f32 to vector<4x128xf32>
    %66 = arith.subf %64, %65 : vector<4x128xf32>
    %cst_32 = arith.constant 0.000000e+00 : f32
    %67 = vector.broadcast %cst_32 : f32 to vector<4x128xf32>
    %68 = arith.maximumf %66, %67 : vector<4x128xf32>
    %cst_33 = arith.constant 1.000000e+00 : f32
    %69 = arith.subf %51, %cst_33 : f32
    %70 = vector.broadcast %69 : f32 to vector<4x128xf32>
    %71 = arith.minimumf %68, %70 : vector<4x128xf32>
    %72 = arith.addf %39, %49 : vector<4x128xf32>
    %cst_34 = arith.constant 1.000000e+00 : f32
    %73 = vector.broadcast %cst_34 : f32 to vector<4x128xf32>
    %74 = arith.subf %72, %73 : vector<4x128xf32>
    %cst_35 = arith.constant 0.000000e+00 : f32
    %75 = vector.broadcast %cst_35 : f32 to vector<4x128xf32>
    %76 = arith.maximumf %74, %75 : vector<4x128xf32>
    %cst_36 = arith.constant 1.000000e+00 : f32
    %77 = arith.subf %50, %cst_36 : f32
    %78 = vector.broadcast %77 : f32 to vector<4x128xf32>
    %79 = arith.minimumf %76, %78 : vector<4x128xf32>
    %c0_37 = arith.constant 0 : index
    %c0_38 = arith.constant 0 : index
    %c0_39 = arith.constant 0 : index
    %80 = vector.load %arg5[%c0_37, %c0_38, %c0_39] : memref<4x4x128xf32, #tpu.memory_space<vmem>>, vector<1x4x128xf32>
    %81 = vector.shape_cast %80 : vector<1x4x128xf32> to vector<4x128xf32>
    %82 = vector.shape_cast %57 : vector<4x128xf32> to vector<1x4x128xf32>
    tpu.vector_store %arg5[%c0_37, %c0_38, %c0_39], %82 {strides = array<i32>} : memref<4x4x128xf32, #tpu.memory_space<vmem>>, vector<1x4x128xf32>,
    %c1_40 = arith.constant 1 : index
    %c0_41 = arith.constant 0 : index
    %c0_42 = arith.constant 0 : index
    %83 = vector.load %arg5[%c1_40, %c0_41, %c0_42] : memref<4x4x128xf32, #tpu.memory_space<vmem>>, vector<1x4x128xf32>
    %84 = vector.shape_cast %83 : vector<1x4x128xf32> to vector<4x128xf32>
    %85 = vector.shape_cast %63 : vector<4x128xf32> to vector<1x4x128xf32>
    tpu.vector_store %arg5[%c1_40, %c0_41, %c0_42], %85 {strides = array<i32>} : memref<4x4x128xf32, #tpu.memory_space<vmem>>, vector<1x4x128xf32>,
    %c2_43 = arith.constant 2 : index
    %c0_44 = arith.constant 0 : index
    %c0_45 = arith.constant 0 : index
    %86 = vector.load %arg5[%c2_43, %c0_44, %c0_45] : memref<4x4x128xf32, #tpu.memory_space<vmem>>, vector<1x4x128xf32>
    %87 = vector.shape_cast %86 : vector<1x4x128xf32> to vector<4x128xf32>
    %88 = vector.shape_cast %71 : vector<4x128xf32> to vector<1x4x128xf32>
    tpu.vector_store %arg5[%c2_43, %c0_44, %c0_45], %88 {strides = array<i32>} : memref<4x4x128xf32, #tpu.memory_space<vmem>>, vector<1x4x128xf32>,
    %c3_46 = arith.constant 3 : index
    %c0_47 = arith.constant 0 : index
    %c0_48 = arith.constant 0 : index
    %89 = vector.load %arg5[%c3_46, %c0_47, %c0_48] : memref<4x4x128xf32, #tpu.memory_space<vmem>>, vector<1x4x128xf32>
    %90 = vector.shape_cast %89 : vector<1x4x128xf32> to vector<4x128xf32>
    %91 = vector.shape_cast %79 : vector<4x128xf32> to vector<1x4x128xf32>
    tpu.vector_store %arg5[%c3_46, %c0_47, %c0_48], %91 {strides = array<i32>} : memref<4x4x128xf32, #tpu.memory_space<vmem>>, vector<1x4x128xf32>,
    %c0_49 = arith.constant 0 : index
    %c0_50 = arith.constant 0 : index
    %92 = vector.load %arg4[%c0_49, %c0_50] : memref<4x128xf32, #tpu.memory_space<vmem>>, vector<4x128xf32>
    %cst_51 = arith.constant 5.000000e-02 : f32
    %93 = vector.broadcast %cst_51 : f32 to vector<4x128xf32>
    %94 = arith.cmpf ogt, %92, %93 : vector<4x128xf32>
    %95 = arith.extui %94 : vector<4x128xi1> to vector<4x128xi32>
    %96 = arith.sitofp %95 : vector<4x128xi32> to vector<4x128xf32>
    %c0_52 = arith.constant 0 : index
    %c0_53 = arith.constant 0 : index
    %97 = vector.load %arg6[%c0_52, %c0_53] : memref<4x128xf32, #tpu.memory_space<vmem>>, vector<4x128xf32>
    tpu.vector_store %arg6[%c0_52, %c0_53], %96 {strides = array<i32>} : memref<4x128xf32, #tpu.memory_space<vmem>>, vector<4x128xf32>,
    return
  }
  func.func @transform_0(%arg0: i32) -> i32 {
    %c0_i32 = arith.constant 0 : i32
    %c0_i32_0 = arith.constant 0 : i32
    return %c0_i32 : i32
  }
  func.func @transform_1(%arg0: i32) -> (i32, i32) {
    %c0_i32 = arith.constant 0 : i32
    %c0_i32_0 = arith.constant 0 : i32
    return %c0_i32, %arg0 : i32, i32
  }
  func.func @transform_2(%arg0: i32) -> (i32, i32, i32) {
    %c0_i32 = arith.constant 0 : i32
    %c0_i32_0 = arith.constant 0 : i32
    %c0_i32_1 = arith.constant 0 : i32
    return %c0_i32, %c0_i32_0, %arg0 : i32, i32, i32
  }
  func.func @transform_3(%arg0: i32) -> (i32, i32) {
    %c0_i32 = arith.constant 0 : i32
    %c0_i32_0 = arith.constant 0 : i32
    return %c0_i32, %arg0 : i32, i32
  }
  func.func @transform_4(%arg0: i32) -> (i32, i32, i32) {
    %c0_i32 = arith.constant 0 : i32
    %c0_i32_0 = arith.constant 0 : i32
    %c0_i32_1 = arith.constant 0 : i32
    return %c0_i32, %c0_i32_0, %arg0 : i32, i32, i32
  }
  func.func @transform_5(%arg0: i32) -> (i32, i32) {
    %c0_i32 = arith.constant 0 : i32
    %c0_i32_0 = arith.constant 0 : i32
    return %c0_i32, %arg0 : i32, i32
  }
}

</mosaic_0001>

<bundles_post_ra>
// kernel: mask_roi_decode.1
= control target key start
LH: loop header
LB: loop body
LE: loop exit
PB: predicated region body
PF: predicated region fallthrough
CT: control target
= control target key end

     0   :  { %11 = vsyncpa [#allocation4], 0  ;;  %s262_s0 = inlined_call_operand.vmem [shape: f32[2], index: 0, kind: input, shape index: {}]   ;;  %s263_s1 = inlined_call_operand.vmem [shape: f32[4,128], index: 1, kind: input, shape index: {}]   ;;  %s264_s2 = inlined_call_operand.vmem [shape: f32[4,4,128], index: 2, kind: input, shape index: {}]   ;;  %s265_s3 = inlined_call_operand.vmem [shape: f32[4,128], index: 3, kind: input, shape index: {}]   ;;  %s266_s4 = inlined_call_operand.vmem [shape: f32[4,4,128], index: 4, kind: output, shape index: {0}]   ;;  %s267_s5 = inlined_call_operand.hbm [shape: f32[4,128], index: 5, kind: output, shape index: {1}]  }
   0x1   :  { %12 = vsyncpa [#allocation3], 0  ;;  %s18_s20 = sshll.u32 %s262_s0, 4  ;;  %s184_s21 = smov [#allocation2]   ;;  %s19_s20 = int_to_ptr.vmem [resolvable:$true] %s18_s20 }
   0x2   :  { %21 = dma.vmem_to_smem %s19_s20, 16, %s184_s21, [#allocation4]  }
   0x3   :  { %180 = dma.done.wait [#allocation4], 16  }
   0x4   :  { %181 = vsyncadd [#allocation4], 4294967280 }
   0x5   :  { %32 = sfence }
   0x6   :  { %v99_v0 = vld [vmem:[%s265_s3] sm:$0xf]  ;;  %v185_v3 = vmov 0.0   ;;  %v126_v7 = vld [vmem:[%s264_s2 + $0x8] sm:$0xf]  ;;  %s186_s3 = smov [#allocation5]  }
   0x7   :  { %v33_v1 = vld [vmem:[%s263_s1] sm:$0x1]  ;;  %vm100_vm0 = vcmp.gt.f32.partialorder %v99_v0, 0.05  ;;  %v35_v2 = vld [vmem:[%s263_s1 + $0x2] sm:$0x1] }
   0x8   :  { %v136_v4 = vsel %vm100_vm0, 1.0, %v185_v3  ;;  %v37_v5 = vsub.f32 %v35_v2, %v33_v1  ;;  %v45_v6 = vld [vmem:[%s264_s2] sm:$0xf]  ;;  %s111_s6 = sshll.u32 %s186_s3, 4  ;;  %v52_v8 = vmul.f32 0.2, %v126_v7  ;;  %s112_s6 = int_to_ptr.vmem [resolvable:$true] %s111_s6 }
   0x9   :  { %103 = vst [vmem:[#allocation5] sm:$0xf] %v136_v4  ;;  %v34_v10 = vld [vmem:[%s263_s1 + $0x1] sm:$0x1]  ;;  %v36_v11 = vld [vmem:[%s263_s1 + $0x3] sm:$0x1] }
   0xa   :  { %v38_v9 = vadd.f32 1.0, %v37_v5  ;;  %s113_s13 = sshll.u32 %s267_s5, 4  ;;  %v46_v12 = vmul.f32 0.1, %v45_v6  ;;  %v64_v13 = vmul.f32 1.442695, %v52_v8  ;;  %v39_v14 = vsub.f32 %v36_v11, %v34_v10  ;;  %s114_s13 = int_to_ptr.hbm [resolvable:$true] %s113_s13 }
   0xb   :  { %v127_v15 = vld [vmem:[%s264_s2 + $0xc] sm:$0xf]  ;;  %v125_v18 = vld [vmem:[%s264_s2 + $0x4] sm:$0xf]  ;;  %s128_s1 = sld [smem:[#allocation2 + $0x1]] }
   0xc   :  { %v41_v16 = vmul.f32 0.5, %v38_v9  ;;  %v56_v17 = vperm.slane %v38_v9, 0  ;;  %v55_v19 = vmul.f32 0.2, %v127_v15  ;;  %140 = vpow2.f32 %v64_v13  ;;  %116 = dma.vmem_to_hbm [thread:$0]  %s112_s6, 64, %s114_s13, [#allocation3]  }
   0xd   :  { %v40_v20 = vadd.f32 1.0, %v39_v14  ;;  %v49_v24 = vmul.f32 0.1, %v125_v18  ;;  %s72_s5 = sld [smem:[#allocation2]] }
   0xe   :  { %v42_v21 = vadd.f32 %v41_v16, %v33_v1  ;;  %v68_v22 = vmul.f32 1.442695, %v55_v19  ;;  %v57_v26 = vmul.f32 %v56_v17, %v46_v12 }
   0xf   :  { %v43_v23 = vmul.f32 0.5, %v40_v20  ;;  %v60_v25 = vperm.slane %v40_v20, 0 }
  0x10   :  { %v58_v27 = vperm.slane %v42_v21, 0  ;;  %142 = vpow2.f32 %v68_v22 }
  0x11   :  { %v44_v28 = vadd.f32 %v43_v23, %v34_v10  ;;  %v61_v30 = vmul.f32 %v60_v25, %v49_v24  ;;  %s129_s2 = sadd.f32 -1.0, %s128_s1 }
  0x12   :  { %v141_v29 = vpop.eup %140  ;;  %v59_v32 = vadd.f32 %v58_v27, %v57_v26 }
  0x13   :  { %v62_v31 = vperm.slane %v44_v28, 0  ;;  %v66_v33 = vmul.f32 %v141_v29, %v56_v17  ;;  %s130_s18 = sadd.f32 -1.0, %s72_s5  ;;  %v77_v40 = vstv %s129_s2 }
  0x15   :  { %v67_v35 = vmul.f32 0.5, %v66_v33  ;;  %v63_v36 = vadd.f32 %v62_v31, %v61_v30  ;;  %v82_v47 = vstv %s130_s18 }
  0x16   :  { %v143_v34 = vpop.eup %142 }
  0x17   :  { %v70_v37 = vmul.f32 %v143_v34, %v60_v25  ;;  %v74_v38 = vsub.f32 %v59_v32, %v67_v35  ;;  %v84_v39 = vadd.f32 %v67_v35, %v59_v32 }
  0x19   :  { %v71_v41 = vmul.f32 0.5, %v70_v37  ;;  %v75_v42 = vmax.f32 %v74_v38, 0.0  ;;  %v131_v43 = vadd.f32 -1.0, %v84_v39 }
  0x1b   :  { %v79_v44 = vsub.f32 %v63_v36, %v71_v41  ;;  %v88_v45 = vadd.f32 %v71_v41, %v63_v36  ;;  %v78_v46 = vmin.f32 %v75_v42, %v77_v40  ;;  %v86_v48 = vmax.f32 %v131_v43, 0.0 }
  0x1d   :  { %v80_v49 = vmax.f32 %v79_v44, 0.0  ;;  %v132_v50 = vadd.f32 -1.0, %v88_v45  ;;  %92 = vst [vmem:[%s266_s4] sm:$0xf] %v78_v46  ;;  %v87_v51 = vmin.f32 %v86_v48, %v77_v40 }
  0x1f   :  { %v83_v52 = vmin.f32 %v80_v49, %v82_v47  ;;  %v90_v53 = vmax.f32 %v132_v50, 0.0  ;;  %134 = vst [vmem:[%s266_s4 + $0x8] sm:$0xf] %v87_v51 }
  0x21   :  { %133 = vst [vmem:[%s266_s4 + $0x4] sm:$0xf] %v83_v52  ;;  %v91_v54 = vmin.f32 %v90_v53, %v82_v47 }
  0x23   :  { %135 = vst [vmem:[%s266_s4 + $0xc] sm:$0xf] %v91_v54 }
  0x24   :  { %182 = dma.done.wait [#allocation3], 64  }
  0x25   :  { %183 = vsyncadd [#allocation3], 4294967232 }
  0x26   :  { %123 = vsyncpa [#allocation3], 1 }
  0x27   :  { %124 = vsyncpa [#allocation4], 1 }

</bundles_post_ra>
